<compile_context>
chip_gen: v6e
topology: v6e:2x2x1
jax: 0.10.0
libtpu: 0.0.40
codegen_flags: <defaults>
</compile_context>

<pallas_src>
import jax
import jax.numpy as jnp
from jax.experimental import pallas as pl
from jax.experimental.pallas import tpu as pltpu

_NEG_BIG = -1e30  # padded-class bias (representable in bf16 and f32)


def _round_up(x, m):
    return ((x + m - 1) // m) * m


def _nll_kernel(h_ref, w_ref, b_ref, labels_ref, logits_ref, ce_ref):
    """One row-tile: classifier matmul + log-sum-exp + masked CE partial.

    h_ref:      (TILE_N, H)      bf16  hidden states (streamed)
    w_ref:      (H, C_PAD)       bf16  classifier weight (VMEM-resident)
    b_ref:      (1, C_PAD)       f32   bias; padded cols = -1e30
    labels_ref: (TILE_N, 1)      i32   labels, -1 = ignore (incl. row padding)
    logits_ref: (TILE_N, C_PAD)  bf16  lane-dense logits writeback
    ce_ref:     (1, 1, 128)      f32   tile CE sum in lane 0 (lane-dense store)
    """
    # Classifier: bf16 inputs, f32 accumulation on the MXU.
    logits = jnp.dot(h_ref[...], w_ref[...],
                     preferred_element_type=jnp.float32) + b_ref[...]
    logits_ref[...] = logits.astype(logits_ref.dtype)      # unmasked full-lane store

    # log-sum-exp over classes (padded cols at ~-1e30 underflow to 0 in exp).
    m = jnp.max(logits, axis=-1, keepdims=True)
    lse = jnp.log(jnp.sum(jnp.exp(logits - m), axis=-1, keepdims=True))

    # CrossEntropy(ignore_index=-1) partial: ce_row = m + lse - logits[label].
    labels = labels_ref[...]                                # (TILE_N, 1) int32
    tn, c_pad = logits.shape
    cls_iota = jax.lax.broadcasted_iota(jnp.int32, (tn, c_pad), 1)
    picked = jnp.sum(jnp.where(labels == cls_iota, logits, 0.0),
                     axis=-1, keepdims=True)                # (TILE_N, 1)
    valid = (labels != -1).astype(jnp.float32)              # mask is mandatory here
    ce_sum = jnp.sum((m + lse - picked) * valid)

    # Lane-dense (1,1,128) partial: sum in lane 0, zeros elsewhere.
    lane = jax.lax.broadcasted_iota(jnp.int32, ce_ref.shape, 2)
    ce_ref[...] = jnp.where(lane == 0, ce_sum, 0.0)


def nll_model_forward(h2d, w, b, labels_flat, *, alpha_t, n_model, tile_n=2048):
    """Classifier + CrossEntropy(ignore_index=-1) head of NLLModel.forward.

    h2d:         (N, H)  hidden states (bf16 preferred; cast if not)
    w:           (H, C)  classifier weight (Linear weight^T)
    b:           (1, C)  classifier bias
    labels_flat: (N,)    int labels, -1 = ignore

    Returns (loss, logits) where logits is (N, C_PAD) with C_PAD =
    round_up(C, 128); columns >= C are padding (~ -1e30) and must be sliced or
    masked by the consumer (kept lane-dense to avoid an extra full relayout
    pass over the largest output).
    """
    del n_model  # identical eval-mode passes: mean CE == single CE, KL reg == 0.

    n, hdim = h2d.shape
    c = w.shape[1]
    c_pad = _round_up(c, 128)

    # ---- row tile: multiple of 8; >= 2 roughly balanced blocks (v7x megacore);
    #      capped by computed VMEM footprint. ----
    tile = _round_up(max(8, min(int(tile_n), n)), 8)
    if n >= 16:
        tile = min(tile, _round_up(-(-n // 2), 8))          # at least 2 blocks

    def footprint(t):
        def tb(rows, cols, itemsize):                       # VMEM-padded tile bytes
            return _round_up(rows, 8) * _round_up(cols, 128) * itemsize
        return 2 * (tb(t, hdim, 2)          # h stream (bf16, double-buffered)
                    + tb(t, c_pad, 2)       # logits out (bf16)
                    + tb(t, 1, 4)           # labels (i32)
                    + tb(1, 128, 4)         # CE partial row
                    + tb(hdim, c_pad, 2)    # resident W
                    + tb(1, c_pad, 4))      # resident bias

    while footprint(tile) > (40 << 20) and tile > 8:        # headroom on v7x's 64 MiB
        tile = max(8, _round_up(tile // 2, 8))

    nb = -(-n // tile)
    if nb > 1 and nb % 2 == 1:                              # prefer even block count
        tile = _round_up(-(-n // (nb + 1)), 8)

    n_pad = _round_up(n, tile)
    num_blocks = n_pad // tile
    vmem_limit = int(min(64 << 20, max(8 << 20, 2 * footprint(tile))))

    # ---- class padding: zero weight cols, -1e30 bias -> softmax unchanged ----
    w_in = jnp.pad(w.astype(jnp.bfloat16), ((0, 0), (0, c_pad - c)))
    b_in = jnp.pad(b.reshape(1, c).astype(jnp.float32), ((0, 0), (0, c_pad - c)),
                   constant_values=_NEG_BIG)

    # ---- rows: pad only the tail (no full-stream copy when already aligned) ----
    h_in = h2d if h2d.dtype == jnp.bfloat16 else h2d.astype(jnp.bfloat16)
    labels_in = labels_flat.astype(jnp.int32).reshape(n, 1)
    if n_pad != n:
        h_in = jnp.pad(h_in, ((0, n_pad - n), (0, 0)))
        labels_in = jnp.pad(labels_in, ((0, n_pad - n), (0, 0)), constant_values=-1)

    logits_pad, ce_parts = pl.pallas_call(
        _nll_kernel,
        grid_spec=pltpu.PrefetchScalarGridSpec(
            num_scalar_prefetch=0,
            grid=(num_blocks,),
            in_specs=[
                pl.BlockSpec((tile, hdim), lambda i: (i, 0)),    # h stream
                pl.BlockSpec((hdim, c_pad), lambda i: (0, 0)),   # W resident
                pl.BlockSpec((1, c_pad), lambda i: (0, 0)),      # b resident
                pl.BlockSpec((tile, 1), lambda i: (i, 0)),       # labels
            ],
            out_specs=(
                pl.BlockSpec((tile, c_pad), lambda i: (i, 0)),   # logits (bf16)
                pl.BlockSpec((1, 1, 128), lambda i: (i, 0, 0)),  # CE partial row
            ),
        ),
        out_shape=(
            jax.ShapeDtypeStruct((n_pad, c_pad), jnp.bfloat16),
            jax.ShapeDtypeStruct((num_blocks, 1, 128), jnp.float32),
        ),
        compiler_params=pltpu.CompilerParams(
            dimension_semantics=("parallel",),
            vmem_limit_bytes=vmem_limit,
        ),
        # TODO(synk): pipeline_mode=pl.Buffered(1) on the resident W/b specs would
        # drop their redundant second buffer; skipped (only matters for large H).
    )(h_in, w_in, b_in, labels_in)

    # ---- scalar finalization in plain JAX (grid axis stays "parallel") ----
    n_valid = jnp.sum((labels_flat != -1).astype(jnp.float32))   # labels-only
    ce_loss = jnp.sum(ce_parts) / jnp.maximum(n_valid, 1.0)      # all-ignored guard
    reg_loss = jnp.float32(0.0)   # KL(avg_prob, prob) == 0 for identical eval passes
    loss = ce_loss + jnp.float32(alpha_t) * reg_loss

    return loss, logits_pad[:n]   # row slice only; class cols stay lane-dense


def _reference(h2d, w, b, labels_flat):
    """Pure-JAX reference with the same bf16 matmul inputs (sanity check)."""
    logits = jnp.dot(h2d.astype(jnp.bfloat16), w.astype(jnp.bfloat16),
                     preferred_element_type=jnp.float32) + b.astype(jnp.float32)
    logp = jax.nn.log_softmax(logits, axis=-1)
    labels = labels_flat.astype(jnp.int32)
    valid = (labels != -1).astype(jnp.float32)
    safe_labels = jnp.where(labels < 0, 0, labels)
    picked = jnp.take_along_axis(logp, safe_labels[:, None], axis=-1)[:, 0]
    ce = jnp.sum(-picked * valid) / jnp.maximum(jnp.sum(valid), 1.0)
    return ce, logits


if __name__ == "__main__":
    # Small, module-consistent shapes.
    B, S, H, C, V = 2, 8, 32, 8, 50          # batch, seq, hidden, num_class, vocab
    ALPHA_T = 0.5
    N_MODEL = 2

    key = jax.random.PRNGKey(0)
    k_emb, k_w, k_b, k_ids, k_lab = jax.random.split(key, 5)

    # --- deterministic parameter init (synthetic; shapes from __init__) ---
    emb_table = jax.random.normal(k_emb, (V, H), dtype=jnp.float32) * 0.02
    clf_w = jax.random.normal(k_w, (H, C), dtype=jnp.float32) * 0.02   # Linear(H,C) weight^T
    clf_b = jax.random.normal(k_b, (1, C), dtype=jnp.float32) * 0.02   # Linear bias

    # --- inputs ---
    input_ids = jax.random.randint(k_ids, (B, S), 0, V, dtype=jnp.int32)
    attention_mask = jnp.ones((B, S), dtype=jnp.float32)
    labels = jax.random.randint(k_lab, (B, S), 0, C, dtype=jnp.int32)
    labels = labels.at[0, 0].set(-1).at[1, S - 1].set(-1)              # ignored positions

    # --- backbone stand-in (plain-JAX glue; see TODO above) ---
    # Produce hidden states directly in bf16 so the kernel's dominant HBM read
    # stream is not re-cast/copied by the wrapper; dropout = identity (eval).
    h = emb_table[input_ids] * attention_mask[..., None]               # (B, S, H)
    h2d = h.reshape(B * S, H).astype(jnp.bfloat16)
    labels_flat = labels.reshape(-1)

    loss, logits_padded = nll_model_forward(
        h2d, clf_w, clf_b, labels_flat, alpha_t=ALPHA_T, n_model=N_MODEL)
    jax.block_until_ready((loss, logits_padded))

    # Consumer-side handling of the lane-dense padded class columns.
    logits = logits_padded[:, :C].astype(jnp.float32)
    assert logits.shape == (B * S, C)
    assert bool(jnp.isfinite(loss))

    ref_loss, ref_logits = _reference(h2d, clf_w, clf_b, labels_flat)
    ref_total = ref_loss + ALPHA_T * 0.0
    assert bool(jnp.allclose(loss, ref_total, rtol=1e-3, atol=1e-3))
    assert bool(jnp.allclose(logits, ref_logits, rtol=2e-2, atol=2e-3))  # bf16 logits
    print("KERNEL_OK")
</pallas_src>

<mosaic_0001>
module attributes {stable_mosaic.version = 11 : i64} {
  func.func @_nll_kernel(%arg0: i32, %arg1: memref<8x32xbf16, #tpu.memory_space<vmem>>, %arg2: memref<32x128xbf16, #tpu.memory_space<vmem>>, %arg3: memref<1x128xf32, #tpu.memory_space<vmem>>, %arg4: memref<8x1xi32, #tpu.memory_space<vmem>>, %arg5: memref<8x128xbf16, #tpu.memory_space<vmem>>, %arg6: memref<1x1x128xf32, #tpu.memory_space<vmem>>) attributes {dimension_semantics = [#tpu.dimension_semantics<parallel>], iteration_bounds = array<i64: 2>, scalar_prefetch = 0 : i64, scratch_operands = 0 : i64, tpu.core_type = #tpu.core_type<tc>, window_params = [{transform_indices = @transform_0, window_bounds = array<i64: 8, 32>}, {pipeline_mode = #tpu.pipeline_mode<synchronous>, transform_indices = @transform_1, window_bounds = array<i64: 32, 128>}, {pipeline_mode = #tpu.pipeline_mode<synchronous>, transform_indices = @transform_2, window_bounds = array<i64: 1, 128>}, {transform_indices = @transform_3, window_bounds = array<i64: 8, 1>}, {transform_indices = @transform_4, window_bounds = array<i64: 8, 128>}, {transform_indices = @transform_5, window_bounds = array<i64: 1, 1, 128>}]} {
    %c0 = arith.constant 0 : index
    %c0_0 = arith.constant 0 : index
    %0 = vector.load %arg1[%c0, %c0_0] : memref<8x32xbf16, #tpu.memory_space<vmem>>, vector<8x32xbf16>
    %c0_1 = arith.constant 0 : index
    %c0_2 = arith.constant 0 : index
    %1 = vector.load %arg2[%c0_1, %c0_2] : memref<32x128xbf16, #tpu.memory_space<vmem>>, vector<32x128xbf16>
    %cst = arith.constant dense<0.000000e+00> : vector<8x128xf32>
    %2 = tpu.matmul %0, %1, %cst {dimension_numbers = #tpu.dot_dimension_numbers<[1], [0], [0], [1], [0, 0, 1, 1], [], []>} : vector<8x32xbf16>, vector<32x128xbf16>, vector<8x128xf32> -> vector<8x128xf32>
    %c0_3 = arith.constant 0 : index
    %c0_4 = arith.constant 0 : index
    %3 = vector.load %arg3[%c0_3, %c0_4] : memref<1x128xf32, #tpu.memory_space<vmem>>, vector<1x128xf32>
    %4 = vector.broadcast %3 : vector<1x128xf32> to vector<8x128xf32>
    %5 = arith.addf %2, %4 : vector<8x128xf32>
    %6 = arith.truncf %5 : vector<8x128xf32> to vector<8x128xbf16>
    %c0_5 = arith.constant 0 : index
    %c0_6 = arith.constant 0 : index
    %7 = vector.load %arg5[%c0_5, %c0_6] : memref<8x128xbf16, #tpu.memory_space<vmem>>, vector<8x128xbf16>
    tpu.vector_store %arg5[%c0_5, %c0_6], %6 {strides = array<i32>} : memref<8x128xbf16, #tpu.memory_space<vmem>>, vector<8x128xbf16>,
    %cst_7 = arith.constant dense<0xFF800000> : vector<8xf32>
    %8 = vector.multi_reduction <maximumf>, %5, %cst_7 [1] : vector<8x128xf32> to vector<8xf32>
    %9 = vector.shape_cast %8 : vector<8xf32> to vector<8x1xf32>
    %10 = vector.broadcast %9 : vector<8x1xf32> to vector<8x128xf32>
    %11 = arith.subf %5, %10 : vector<8x128xf32>
    %12 = math.exp %11 : vector<8x128xf32>
    %cst_8 = arith.constant dense<0.000000e+00> : vector<8xf32>
    %13 = vector.multi_reduction <add>, %12, %cst_8 [1] : vector<8x128xf32> to vector<8xf32>
    %14 = vector.shape_cast %13 : vector<8xf32> to vector<8x1xf32>
    %15 = math.log %14 : vector<8x1xf32>
    %c0_9 = arith.constant 0 : index
    %c0_10 = arith.constant 0 : index
    %16 = vector.load %arg4[%c0_9, %c0_10] : memref<8x1xi32, #tpu.memory_space<vmem>>, vector<8x1xi32>
    %17 = tpu.iota {dimensions = array<i32: 1>} : vector<8x128xi32>
    %18 = vector.broadcast %16 : vector<8x1xi32> to vector<8x128xi32>
    %19 = arith.cmpi eq, %18, %17 : vector<8x128xi32>
    %cst_11 = arith.constant 0.000000e+00 : f32
    %20 = vector.broadcast %cst_11 : f32 to vector<8x128xf32>
    %21 = arith.select %19, %5, %20 : vector<8x128xi1>, vector<8x128xf32>
    %cst_12 = arith.constant dense<0.000000e+00> : vector<8xf32>
    %22 = vector.multi_reduction <add>, %21, %cst_12 [1] : vector<8x128xf32> to vector<8xf32>
    %23 = vector.shape_cast %22 : vector<8xf32> to vector<8x1xf32>
    %c-1_i32 = arith.constant -1 : i32
    %24 = vector.broadcast %c-1_i32 : i32 to vector<8x1xi32>
    %25 = arith.cmpi ne, %16, %24 : vector<8x1xi32>
    %26 = arith.extui %25 : vector<8x1xi1> to vector<8x1xi32>
    %27 = arith.sitofp %26 : vector<8x1xi32> to vector<8x1xf32>
    %28 = arith.addf %9, %15 : vector<8x1xf32>
    %29 = arith.subf %28, %23 : vector<8x1xf32>
    %30 = arith.mulf %29, %27 : vector<8x1xf32>
    %31 = vector.shape_cast %30 : vector<8x1xf32> to vector<1x8x1xf32>
    %cst_13 = arith.constant dense<0.000000e+00> : vector<1xf32>
    %32 = vector.multi_reduction <add>, %31, %cst_13 [1, 2] : vector<1x8x1xf32> to vector<1xf32>
    %33 = vector.shape_cast %32 : vector<1xf32> to vector<1x1x1xf32>
    %34 = vector.extract %33[0, 0, 0] : f32 from vector<1x1x1xf32>
    %35 = tpu.iota {dimensions = array<i32: 2>} : vector<1x1x128xi32>
    %c0_i32 = arith.constant 0 : i32
    %36 = vector.broadcast %c0_i32 : i32 to vector<1x1x128xi32>
    %37 = arith.cmpi eq, %35, %36 : vector<1x1x128xi32>
    %cst_14 = arith.constant 0.000000e+00 : f32
    %38 = vector.broadcast %34 : f32 to vector<1x1x128xf32>
    %39 = vector.broadcast %cst_14 : f32 to vector<1x1x128xf32>
    %40 = arith.select %37, %38, %39 : vector<1x1x128xi1>, vector<1x1x128xf32>
    %c0_15 = arith.constant 0 : index
    %c0_16 = arith.constant 0 : index
    %c0_17 = arith.constant 0 : index
    %41 = vector.load %arg6[%c0_15, %c0_16, %c0_17] : memref<1x1x128xf32, #tpu.memory_space<vmem>>, vector<1x1x128xf32>
    tpu.vector_store %arg6[%c0_15, %c0_16, %c0_17], %40 {strides = array<i32>} : memref<1x1x128xf32, #tpu.memory_space<vmem>>, vector<1x1x128xf32>,
    return
  }
  func.func @transform_0(%arg0: i32) -> (i32, i32) {
    %c0_i32 = arith.constant 0 : i32
    %c0_i32_0 = arith.constant 0 : i32
    return %arg0, %c0_i32 : i32, i32
  }
  func.func @transform_1(%arg0: i32) -> (i32, i32) {
    %c0_i32 = arith.constant 0 : i32
    %c0_i32_0 = arith.constant 0 : i32
    %c0_i32_1 = arith.constant 0 : i32
    return %c0_i32, %c0_i32_0 : i32, i32
  }
  func.func @transform_2(%arg0: i32) -> (i32, i32) {
    %c0_i32 = arith.constant 0 : i32
    %c0_i32_0 = arith.constant 0 : i32
    %c0_i32_1 = arith.constant 0 : i32
    return %c0_i32, %c0_i32_0 : i32, i32
  }
  func.func @transform_3(%arg0: i32) -> (i32, i32) {
    %c0_i32 = arith.constant 0 : i32
    %c0_i32_0 = arith.constant 0 : i32
    return %arg0, %c0_i32 : i32, i32
  }
  func.func @transform_4(%arg0: i32) -> (i32, i32) {
    %c0_i32 = arith.constant 0 : i32
    %c0_i32_0 = arith.constant 0 : i32
    return %arg0, %c0_i32 : i32, i32
  }
  func.func @transform_5(%arg0: i32) -> (i32, i32, i32) {
    %c0_i32 = arith.constant 0 : i32
    %c0_i32_0 = arith.constant 0 : i32
    %c0_i32_1 = arith.constant 0 : i32
    return %arg0, %c0_i32, %c0_i32_0 : i32, i32, i32
  }
}

</mosaic_0001>

<bundles_post_ra>
// kernel: tpu_custom_call.1
= control target key start
LH: loop header
LB: loop body
LE: loop exit
PB: predicated region body
PF: predicated region fallthrough
CT: control target
= control target key end

     0   :  { %11 = vsyncpa [#allocation3], 0  ;;  %s959_s0 = inlined_call_operand.hbm [shape: bf16[16,32], index: 0, kind: input, shape index: {}]   ;;  %s960_s1 = inlined_call_operand.vmem [shape: bf16[32,128], index: 1, kind: input, shape index: {}]   ;;  %s961_s2 = inlined_call_operand.vmem [shape: f32[1,128], index: 2, kind: input, shape index: {}]   ;;  %s962_s3 = inlined_call_operand.vmem [shape: s32[16,1], index: 3, kind: input, shape index: {}]   ;;  %s963_s4 = inlined_call_operand.hbm [shape: bf16[16,128], index: 4, kind: output, shape index: {0}]   ;;  %s964_s5 = inlined_call_operand.hbm [shape: f32[2,1,128], index: 5, kind: output, shape index: {1}]  }
   0x1   :  { %13 = vsyncpa [#allocation3 + $0x1], 0 }
   0x2   :  { %14 = vsyncpa [#allocation4], 0 }
   0x3   :  { %16 = vsyncpa [#allocation4 + $0x1], 0 }
   0x4   :  { %17 = vsyncpa [#allocation7], 0 }
   0x5   :  { %19 = vsyncpa [#allocation7 + $0x1], 0  ;;  %s772_s18 = smov 0   ;;  %s774_s19 = smov 0  }
   0x6   :  { %s776_s20 = smov 0   ;;  %s778_s21 = smov 0  }
   0x7 LB: > { %s793_s22 = sadd.s32 4294967295, %s734_s21   ;;  %s519_s23 = sadd.s32 4294967294, %s734_s21   ;;  %s734_s21 = sphi %s778_s21, %s981_s21   ;;  %s730_s20 = sphi %s776_s20, %s980_s20   ;;  %s726_s19 = sphi %s774_s19, %s979_s19   ;;  %s722_s18 = sphi %s772_s18, %s978_s18  }
   0x8   : > { %s797_s24 = sadd.s32 1, %s734_s21   ;;  %s32_s25 = sadd.s32 1, %s730_s20 }
   0x9   : > { %s29_s26 = ssub.s32 %s734_s21, %s797_s24  ;;  %p39_p0 = scmp.ne.s32.totalorder %s730_s20, %s726_s19 }
   0xa   : > { %p30_p1 = scmp.eq.s32.totalorder %s29_s26, 0  ;;  %p40_p2 = scmp.eq.s32.totalorder %s734_s21, 0 }
   0xb   : > { %p45_p3 = scmp.ne.s32.totalorder %s726_s19, %s722_s18  ;;  %p46_p4 = scmp.eq.s32.totalorder %s793_s22, 0 }
   0xc   : > { %s809_s27 = scalar_select %p30_p1, %s730_s20, %s32_s25  }
   0xd   : > { %p811_p5 = por %p40_p2, %p39_p0  ;;  %p815_p6 = por %p46_p4, %p45_p3 }
   0xe   : > { %p137_p7 = scmp.eq.s32.totalorder %s793_s22, 1  ;;  %p143_p8 = scmp.eq.s32.totalorder %s519_s23, 1 }
   0xf   : > { %s968_s29 = scalar_select %p815_p6, 1, 0 }
  0x10   : > { %p568_p10 = scmp.lt.s32.totalorder %s734_s21, 2  ;;  %p822_p11 = por %p137_p7, %p39_p0 }
  0x11   : > { %p826_p12 = por %p143_p8, %p45_p3  ;;  %s195_s7 = sand.u32 1, %s730_s20  }
  0x12   : > { %s969_s30 = scalar_select %p822_p11, 1, 0 }
  0x13   : > { %s970_s6 = scalar_select %p826_p12, 1, 0 }
  0x14   : > { %s523_s8 = sshll.u32 %s734_s21, 6  ;;  %s522_s9 = sshll.u32 %s195_s7, 2 }
  0x15   : > { %s835_s12 = scalar_lea.hbm %s959_s0, %s523_s8  ;;  %s199_s13 = scalar_lea.vmem [#allocation2], %s522_s9 }
  0x16   : > { %s206_s14 = sshll.u32 %s199_s13, 4  ;;  %p839_p13 = pnand %p568_p10, %p811_p5  ;;  %s843_s14 = int_to_ptr.vmem [resolvable:$true] %s206_s14 }
  0x17   : > { %s196_s16 = scalar_lea.sflag [#allocation3], %s195_s7  ;;  %s612_s17 = scalar_lea.hbm %s835_s12, 64 }
  0x18   : > { %p613_p2 = scmp.ne.s32.totalorder %s835_s12, %s612_s17  ;;  %p614_p3 = pneg %p839_p13 }
  0x19   : > { %s617_s26 = scalar_lea.hbm %s959_s0, 128  ;;  %p618_p5 = scmp.lt.s32.totalorder %s835_s12, %s959_s0 }
  0x1a   : > { %p615_p4 = pnand %p614_p3, %p613_p2  ;;  %p619_p8 = scmp.lt.s32.totalorder %s617_s26, %s612_s17 }
  0x1c   : > { %p616_p7 = pneg %p615_p4  ;;  %p620_p10 = por %p619_p8, %p618_p5 }
  0x1e   : > { %p621_p9 = pnand %p620_p10, %p616_p7 }
  0x20   : > { %624 = shalt.err (!%p621_p9)
}
  0x21   : > { %s625_s7 = scalar_lea.vmem %s843_s14, 64  ;;  %s736_s9 = smov [#allocation2]  }
  0x22   : > { %p626_p0 = scmp.ne.s32.totalorder %s843_s14, %s625_s7  ;;  %s630_s10 = sshll.u32 %s736_s9, 4  ;;  %s631_s10 = int_to_ptr.vmem [resolvable:$false] %s630_s10 }
  0x23   : > { %s632_s11 = scalar_lea.vmem %s631_s10, 128  ;;  %p633_p4 = scmp.lt.s32.totalorder %s843_s14, %s631_s10 }
  0x24   : > { %p628_p1 = pnand %p626_p0, %p614_p3  ;;  %p634_p12 = scmp.lt.s32.totalorder %s632_s11, %s625_s7 }
  0x26   : > { %p629_p2 = pneg %p628_p1  ;;  %p635_p11 = por %p634_p12, %p633_p4 }
  0x28   : > { %p636_p6 = pnand %p635_p11, %p629_p2 }
  0x2a   : > { %639 = shalt.err (!%p636_p6)
}
  0x2b   : > { %560 = dma.hbm_to_vmem [thread:$0]  (!%p839_p13), %s835_s12, 64, %s843_s14, %s196_s16  }
  0x2c   : > { %p972_p9 = scmp.lt.s32.totalorder %s734_s21, 3  ;;  %p973_p7 = scmp.ge.s32.totalorder %s734_s21, 1 }
  0x2e   : > { %p219_p0 = pnand %p973_p7, %p972_p9 }
  0x2f   : > { %s870_s13 = sand.u32 (!%p219_p0), 1, %s726_s19   ;;  %p974_p6 = scmp.ne.s32.totalorder (!%p219_p0), %s968_s29, 0 }
  0x30   : > { %222 = sbr.rel (%p219_p0) target bundleno = 790 (0x316), region = 36  ;;  %s525_s17 = sshll.u32 (!%p219_p0), %s870_s13, 2 }
  0x31   : > { %s225_s23 = scalar_lea.sflag (!%p219_p0), [#allocation3], %s870_s13  ;;  %s228_s25 = scalar_lea.vmem (!%p219_p0), [#allocation2], %s525_s17 }
  0x35   : > { %709 = dma.done.wait (%p974_p6), %s225_s23, 64  }
  0x36   : > { %711 = vsyncadd (%p974_p6), %s225_s23, 4294967232  ;;  %v737_v0 = vmov 0.0   ;;  %vm738_vm0 = vmmov 0   ;;  %v606_v1 = vld [vmem:[%s960_s1 + $0x8] sm:$0xff]   ;;  %v607_v2 = vld [vmem:[%s960_s1] sm:$0xff]   ;;  %vm292_vm1 = vcmask 261120   ;;  %v348_v16 = vlaneseq }
  0x37   : > { %541 = vmatprep.subr.bf16.mxu0 %v737_v0  ;;  %545 = vmatprep.mubr.msk.bf16.mxu0 %vm738_vm0, %v737_v0  ;;  %v268_v3 = vld [vmem:[%s228_s25] sm:$0xf]  ;;  %v739_v4 = vmov 0   ;;  %s887_s28 = scalar_lea.vmem [#allocation5], %s525_s17  ;;  %p263_p11 = scmp.lt.s32.totalorder %s793_s22, 1  ;;  %vm363_vm4 = vcmask 7168  }
  0x38   : > { %542 = vmatpush3.bf16.msra.mxu0 %v606_v1  ;;  %605 = vset.pattern.permute.xlu0 %v739_v4  ;;  %v528_v5 = vld [vmem:[%s961_s2] ss:$0 sm:$0xff]  ;;  %v895_v17 = vand.u32 127, %v348_v16  ;;  %s534_s17 = sshll.u32 %s793_s22, 6  ;;  %s396_s23 = sshll.u32 %s887_s28, 4  ;;  %s397_s23 = int_to_ptr.vmem [resolvable:$true] %s396_s23 }
  0x39   : > { %543 = vmatprep.subr.bf16.mxu0 %v737_v0  ;;  %s264_s8 = scalar_select %p263_p11, %s793_s22, 1 }
  0x3a   : > { %s394_s14 = scalar_lea.hbm %s963_s4, %s534_s17  ;;  %s379_s15 = scalar_lea.sflag [#allocation4], %s870_s13 }
  0x3b   : > { %s527_s7 = sshll.u32 %s264_s8, 3  ;;  %s640_s16 = scalar_lea.vmem %s397_s23, 64 }
  0x3c   : > { %544 = vmatpush3.bf16.msra.mxu0 %v607_v2  ;;  %s266_s11 = scalar_lea.vmem %s962_s3, %s527_s7  ;;  %p641_p12 = scmp.ne.s32.totalorder %s397_s23, %s640_s16 }
  0x3d   : > { %v347_v12 = vld [vmem:[%s266_s11] sm:$0xff]  ;;  %p975_p13 = scmp.ne.s32.totalorder %s969_s30, 0  ;;  %s740_s29 = smov [#allocation5]  }
  0x3e   : > { %vm357_vm3 = vcmp.ne.s32.totalorder %v347_v12, 4294967295  ;;  %s644_s26 = sshll.u32 %s740_s29, 4  ;;  %s645_s26 = int_to_ptr.vmem [resolvable:$false] %s644_s26 }
  0x3f   : > { %546 = vmatmul.mubr.msk.bf16.vlgmr.msra.gmra.mxu0 %vm292_vm1, %v268_v3  ;;  %v532_v26 = vsel %vm357_vm3, 1.0, %v737_v0  ;;  %p642_p1 = pnand %p641_p12, %p975_p13  ;;  %s646_s8 = scalar_lea.vmem %s645_s26, 128 }
  0x40   : > { %p647_p5 = scmp.lt.s32.totalorder %s397_s23, %s645_s26  ;;  %p648_p8 = scmp.lt.s32.totalorder %s646_s8, %s640_s16 }
  0x41   : > { %p643_p3 = pneg %p642_p1 }
  0x42   : > { %p649_p10 = por %p648_p8, %p647_p5 }
  0x44   : > { %p650_p2 = pnand %p649_p10, %p643_p3 }
  0xff   : > { %v330_v6 = vpop.f32.mrf.mxu0 }
 0x100   : > { %v331_v7 = vadd.f32 %v528_v5, %v330_v6 }
 0x101   : > { %v547_v8 = vpop.f32.mrf.mxu0 }
 0x102   : > { %v336_v9 = vpack.c.bf16 %v331_v7, %v331_v7  ;;  %338 = vmax.xlane.f32.xlu0 %v331_v7 }
 0x103   : > { %v333_v10 = vpop.f32.mrf.mxu0 }
 0x104   : > { %337 = vst [vmem:[%s887_s28] sm:$0xf] %v336_v9 }
 0x105   : > { %v548_v11 = vpop.f32.mrf.mxu0 }
 0x118   : > { %351 = vperm.xlu0 %605, %v347_v12  }
 0x18b   : > { %v339_v13 = vpop.xlane.xlu0 %338 }
 0x18c   : > { %v340_v14 = vsub.f32 %v331_v7, %v339_v13 }
 0x18e   : > { %v341_v15 = vmul.f32 1.442695, %v340_v14 }
 0x190   : > { %608 = vpow2.f32 %v341_v15 }
 0x193   : > { %v352_v18 = vpop.permute.xlu0 %351 }
 0x194   : > { %vm353_vm2 = vcmp.eq.s32.totalorder %v352_v18, %v895_v17 }
 0x195   : > { %v354_v20 = vsel %vm353_vm2, %v331_v7, 0.0 }
 0x19d   : > { %v609_v19 = vpop.eup %608 }
 0x19e   : > { %343 = vadd.xlane.f32.xlu1 %v609_v19 }
 0x1a2   : > { %355 = vadd.xlane.f32.xlu1 %v354_v20 }
 0x227   : > { %v344_v21 = vpop.xlane.xlu1 %343 }
 0x228   : > { %610 = vlog2.f32 %v344_v21 }
 0x22b   : > { %v356_v25 = vpop.xlane.xlu1 %355 }
 0x235   : > { %v611_v22 = vpop.eup %610 }
 0x236   : > { %v346_v23 = vmul.f32 0.6931472, %v611_v22 }
 0x238   : > { %v360_v24 = vadd.f32 %v346_v23, %v339_v13 }
 0x23a   : > { %v361_v27 = vsub.f32 %v360_v24, %v356_v25 }
 0x23c   : > { %v362_v28 = vmul.f32 %v532_v26, %v361_v27 }
 0x23e   : > { %v364_v29 = vsel %vm363_vm4, %v362_v28, 0.0 }
 0x23f   : > { %365 = vadd.xlane.f32.xlu1 %v364_v29 }
 0x240   : > { %653 = shalt.err (!%p650_p2)
}
 0x241   : > { %s654_s28 = scalar_lea.hbm %s394_s14, 64  ;;  %s658_s10 = scalar_lea.hbm %s963_s4, 128 }
 0x242   : > { %p655_p4 = scmp.ne.s32.totalorder %s394_s14, %s654_s28  ;;  %p659_p0 = scmp.lt.s32.totalorder %s394_s14, %s963_s4 }
 0x243   : > { %p660_p6 = scmp.lt.s32.totalorder %s658_s10, %s654_s28 }
 0x244   : > { %p656_p9 = pnand %p655_p4, %p975_p13 }
 0x245   : > { %p661_p11 = por %p660_p6, %p659_p0 }
 0x246   : > { %p657_p7 = pneg %p656_p9 }
 0x248   : > { %p662_p12 = pnand %p661_p11, %p657_p7 }
 0x24a   : > { %665 = shalt.err (!%p662_p12)
}
 0x24b   : > { %553 = dma.vmem_to_hbm [thread:$0]  (%p975_p13), %s397_s23, 64, %s394_s14, %s379_s15   ;;  %vm374_vm5 = vcmp.eq.s32.totalorder %v895_v17, 0 }
 0x24c   : > { %s535_s25 = sshll.u32 %s793_s22, 4  ;;  %s262_s12 = scalar_lea.vmem [#allocation6], %s870_s13 }
 0x24d   : > { %s409_s16 = sshll.u32 %s262_s12, 4  ;;  %s922_s23 = scalar_lea.hbm %s964_s5, %s535_s25  ;;  %s410_s16 = int_to_ptr.vmem [resolvable:$true] %s409_s16 }
 0x24e   : > { %s384_s14 = scalar_lea.sflag [#allocation7], %s870_s13  ;;  %s666_s15 = scalar_lea.vmem %s410_s16, 16 }
 0x24f   : > { %p667_p1 = scmp.ne.s32.totalorder %s410_s16, %s666_s15  ;;  %s741_s22 = smov [#allocation6]  }
 0x250   : > { %s670_s28 = sshll.u32 %s741_s22, 4  ;;  %s671_s28 = int_to_ptr.vmem [resolvable:$false] %s670_s28 }
 0x251   : > { %p668_p3 = pnand %p667_p1, %p975_p13  ;;  %s672_s7 = scalar_lea.vmem %s671_s28, 32 }
 0x252   : > { %p673_p8 = scmp.lt.s32.totalorder %s410_s16, %s671_s28  ;;  %p674_p10 = scmp.lt.s32.totalorder %s672_s7, %s666_s15 }
 0x253   : > { %p669_p5 = pneg %p668_p3 }
 0x254   : > { %p675_p2 = por %p674_p10, %p673_p8 }
 0x256   : > { %p676_p4 = pnand %p675_p2, %p669_p5 }
 0x2c8   : > { %v366_v30 = vpop.xlane.xlu1 %365 }
 0x2c9   : > { %v367_v31 = vrot.slane %v366_v30, 4 }
 0x2cb   : > { %v368_v32 = vadd.f32 %v367_v31, %v366_v30 }
 0x2cd   : > { %v369_v33 = vrot.slane %v368_v32, 2 }
 0x2cf   : > { %v370_v34 = vadd.f32 %v369_v33, %v368_v32 }
 0x2d1   : > { %v371_v35 = vrot.slane %v370_v34, 1 }
 0x2d3   : > { %v372_v36 = vadd.f32 %v371_v35, %v370_v34 }
 0x2d5   : > { %549 = vpush %v372_v36 }
 0x306   : > { %s550_s29 = spop %549 }
 0x307   : > { %v375_v37 = vstv %s550_s29 }
 0x308   : > { %v376_v38 = vsel %vm374_vm5, %v375_v37, 0.0 }
 0x309   : > { %377 = vst [vmem:[%s262_s12] sm:$0x1] %v376_v38 }
 0x30a   : > { %679 = shalt.err (!%p676_p4)
}
 0x30b   : > { %s680_s9 = scalar_lea.hbm %s922_s23, 16  ;;  %s684_s11 = scalar_lea.hbm %s964_s5, 32 }
 0x30c   : > { %p681_p9 = scmp.ne.s32.totalorder %s922_s23, %s680_s9  ;;  %p685_p6 = scmp.lt.s32.totalorder %s922_s23, %s964_s5 }
 0x30d   : > { %p686_p11 = scmp.lt.s32.totalorder %s684_s11, %s680_s9 }
 0x30e   : > { %p682_p7 = pnand %p681_p9, %p975_p13 }
 0x30f   : > { %p687_p12 = por %p686_p11, %p685_p6 }
 0x310   : > { %p683_p0 = pneg %p682_p7 }
 0x312   : > { %p688_p1 = pnand %p687_p12, %p683_p0 }
 0x314   : > { %691 = shalt.err (!%p688_p1)
}
 0x315   : > { %554 = dma.vmem_to_hbm [thread:$0]  (%p975_p13), %s410_s16, 16, %s922_s23, %s384_s14  }
 0x316 PF: > { %s421_s12 = sand.u32 1, %s722_s18   ;;  %p976_p3 = scmp.ne.s32.totalorder %s970_s6, 0 }
 0x317   : > { %p977_p5 = scmp.ge.s32.totalorder %s734_s21, 2  ;;  %s422_s29 = scalar_lea.sflag [#allocation4], %s421_s12 }
 0x319   : > { %p562_p8 = pnand %p977_p5, %p976_p3 }
 0x31b   : > { %p563_p10 = pneg %p562_p8 }
 0x31d   : > { %713 = dma.done.wait (%p563_p10), %s422_s29, 64  }
 0x31e   : > { %715 = vsyncadd (%p563_p10), %s422_s29, 4294967232  ;;  %s431_s26 = scalar_lea.sflag [#allocation7], %s421_s12 }
 0x31f   : > { %717 = dma.done.wait (%p563_p10), %s431_s26, 16  }
 0x320   : > { %719 = vsyncadd (%p563_p10), %s431_s26, 4294967280  ;;  %p22_p13 = scmp.ge.s32.totalorder %s797_s24, 4   ;;  %s978_s18 = smov %s726_s19 }
 0x321   : > { %s979_s19 = smov %s730_s20  ;;  %s980_s20 = smov %s809_s27 }
 0x322   : > { %s981_s21 = smov %s797_s24  ;;  %24 = sbr.rel (!%p22_p13) target bundleno = 7 (0x7), region = 101 }
 0x327   :  { %435 = vsyncpa [#allocation3], 1 }
 0x328   :  { %437 = vsyncpa [#allocation3 + $0x1], 1 }
 0x329   :  { %438 = vsyncpa [#allocation4], 1 }
 0x32a   :  { %440 = vsyncpa [#allocation4 + $0x1], 1 }
 0x32b   :  { %441 = vsyncpa [#allocation7], 1 }
 0x32c   :  { %443 = vsyncpa [#allocation7 + $0x1], 1 }

</bundles_post_ra>
